<compile_context>
chip_gen: v6e
topology: v6e:2x2x1
jax: 0.10.0
libtpu: 0.0.40
codegen_flags: <defaults>
</compile_context>

<pallas_src>
import jax
import jax.numpy as jnp
from jax import lax
from jax.experimental import pallas as pl
from jax.experimental.pallas import tpu as pltpu


def spatial_attention_kernel(mat_ref, x_ref, o_ref):
    # mat_ref : VMEM (2, HW, HW) f32  -- full zero-padded KxK conv as a matrix
    #                                    per input plane (1/C folded into [0]).
    # x_ref   : VMEM (C, HW)          -- one batch element, spatial flattened.
    # o_ref   : VMEM (C, HW)
    xs = x_ref[...].astype(jnp.float32)                      # (C, HW)

    # Channel statistics: vectorized cross-sublane reductions.
    s = jnp.sum(xs, axis=0, keepdims=True)                   # (1, HW)  (= C*mean)
    m = jnp.max(xs, axis=0, keepdims=True)                   # (1, HW)

    # Zero-padded KxK conv over both planes == two tiny MXU matmuls.
    atten = jnp.dot(s, mat_ref[0], preferred_element_type=jnp.float32)
    atten = atten + jnp.dot(m, mat_ref[1], preferred_element_type=jnp.float32)

    gate = jax.nn.sigmoid(atten)                              # (1, HW), EUP

    # Broadcast-multiply and lane-dense store.
    o_ref[...] = (xs * gate).astype(o_ref.dtype)


def _build_conv_matrices(weight, C, H, W):
    """Host-precomputed (2, HW, HW) matrices such that
       conv2d(cat([sum/C, max], 1), w, padding=K//2) on an (H, W) plane
       == sum_flat @ M[0] + max_flat @ M[1] on row-major-flattened planes."""
    K = weight.shape[-1]
    pad = K // 2
    w = weight.reshape(2, K, K).astype(jnp.float32)
    w = w.at[0].multiply(1.0 / C)        # fold the mean's 1/C into the sum plane

    di = jnp.arange(H)[:, None] - jnp.arange(H)[None, :] + pad    # (H, H_out)
    dj = jnp.arange(W)[:, None] - jnp.arange(W)[None, :] + pad    # (W, W_out)
    vi = (di >= 0) & (di < K)
    vj = (dj >= 0) & (dj < K)
    di = jnp.clip(di, 0, K - 1)
    dj = jnp.clip(dj, 0, K - 1)

    # taps[p, i, i', j, j'] = w[p, i-i'+pad, j-j'+pad] if in-range else 0
    taps = w[:, di[:, :, None, None], dj[None, None, :, :]]       # (2,H,H',W,W')
    mask = (vi[:, :, None, None] & vj[None, None, :, :]).astype(jnp.float32)
    taps = taps * mask
    # reorder to (p, i, j, i', j') and flatten both spatial pairs.
    return taps.transpose(0, 1, 3, 2, 4).reshape(2, H * W, H * W)


def spatial_attention_2d(x, weight):
    """x: (N, C, H, W); weight: (1, 2, K, K) conv weight (no bias)."""
    N, C, H, W = x.shape
    K = weight.shape[-1]
    assert K % 2 == 1, "only odd kernel sizes (3 or 7) match PyTorch padding"
    HW = H * W

    mat = _build_conv_matrices(weight, C, H, W)               # (2, HW, HW) f32
    x_flat = x.reshape(N, C, HW)                              # contiguous view

    # VMEM budget: double-buffered x/out blocks + conv matrices + headroom.
    itemsize = jnp.dtype(x.dtype).itemsize
    block_bytes = C * HW * itemsize
    mat_bytes = 2 * HW * HW * 4
    est = 2 * (mat_bytes + 2 * block_bytes)
    vmem_limit = int(min(max(est + (4 << 20), 16 << 20), 32 << 20))

    # TODO(synk): for large H*W the dense (HW, HW) conv matrices do not fit
    # VMEM; switch to a K*K shift/banded-matrix decomposition and tile H*W with
    # halo blocks (and tile C with a reduce-then-apply grid when C*H*W exceeds
    # the VMEM block budget, esp. on v7x's 64 MiB VMEM).
    out_flat = pl.pallas_call(
        spatial_attention_kernel,
        out_shape=jax.ShapeDtypeStruct((N, C, HW), x.dtype),
        grid=(N,),
        in_specs=[
            pl.BlockSpec((2, HW, HW), lambda n: (0, 0, 0)),        # conv mats
            pl.BlockSpec((None, C, HW), lambda n: (n, 0, 0)),      # x (flat)
        ],
        out_specs=pl.BlockSpec((None, C, HW), lambda n: (n, 0, 0)),
        compiler_params=pltpu.CompilerParams(
            dimension_semantics=("parallel",),
            vmem_limit_bytes=vmem_limit),
    )(mat, x_flat)

    return out_flat.reshape(N, C, H, W)


def reference(x, weight):
    """Pure-JAX reference mirroring the PyTorch module."""
    avg = jnp.mean(x.astype(jnp.float32), axis=1, keepdims=True)
    mx = jnp.max(x.astype(jnp.float32), axis=1, keepdims=True)
    atten = jnp.concatenate([avg, mx], axis=1)                # (N, 2, H, W)
    atten = lax.conv_general_dilated(
        atten, weight.astype(jnp.float32),
        window_strides=(1, 1), padding="SAME",
        dimension_numbers=("NCHW", "OIHW", "NCHW"))
    atten = jax.nn.sigmoid(atten)
    return (x.astype(jnp.float32) * atten).astype(x.dtype)


if __name__ == "__main__":
    key = jax.random.PRNGKey(0)
    kx, kw = jax.random.split(key)

    N, C, H, W = 2, 4, 16, 16
    K = 3  # kernel_size=3 -> padding=1

    x = jax.random.normal(kx, (N, C, H, W), dtype=jnp.float32)

    # Deterministic conv weight init, mimicking PyTorch's default
    # kaiming-uniform bound for Conv2d(2, 1, 3, bias=False).
    bound = 1.0 / jnp.sqrt(2.0 * K * K)
    weight = jax.random.uniform(kw, (1, 2, K, K), dtype=jnp.float32,
                                minval=-bound, maxval=bound)

    out = jax.block_until_ready(spatial_attention_2d(x, weight))
    ref = reference(x, weight)

    assert out.shape == (N, C, H, W)
    assert jnp.allclose(out, ref, atol=2e-5, rtol=2e-5), (
        float(jnp.max(jnp.abs(out - ref))))

    print("KERNEL_OK")
</pallas_src>

<mosaic_0001>
module attributes {stable_mosaic.version = 11 : i64} {
  func.func @spatial_attention_kernel(%arg0: i32, %arg1: memref<2x256x256xf32, #tpu.memory_space<vmem>>, %arg2: memref<1x4x256xf32, #tpu.memory_space<vmem>>, %arg3: memref<1x4x256xf32, #tpu.memory_space<vmem>>) attributes {dimension_semantics = [#tpu.dimension_semantics<parallel>], iteration_bounds = array<i64: 2>, scalar_prefetch = 0 : i64, scratch_operands = 0 : i64, tpu.core_type = #tpu.core_type<tc>, window_params = [{pipeline_mode = #tpu.pipeline_mode<synchronous>, transform_indices = @transform_0, window_bounds = array<i64: 2, 256, 256>}, {transform_indices = @transform_1, window_bounds = array<i64: 1, 4, 256>}, {transform_indices = @transform_2, window_bounds = array<i64: 1, 4, 256>}]} {
    %c0 = arith.constant 0 : index
    %c0_0 = arith.constant 0 : index
    %c0_1 = arith.constant 0 : index
    %0 = vector.load %arg2[%c0, %c0_0, %c0_1] : memref<1x4x256xf32, #tpu.memory_space<vmem>>, vector<1x4x256xf32>
    %1 = vector.shape_cast %0 : vector<1x4x256xf32> to vector<4x256xf32>
    %cst = arith.constant dense<0.000000e+00> : vector<256xf32>
    %2 = vector.multi_reduction <add>, %1, %cst [0] : vector<4x256xf32> to vector<256xf32>
    %3 = vector.shape_cast %2 : vector<256xf32> to vector<1x256xf32>
    %cst_2 = arith.constant dense<0xFF800000> : vector<256xf32>
    %4 = vector.multi_reduction <maximumf>, %1, %cst_2 [0] : vector<4x256xf32> to vector<256xf32>
    %5 = vector.shape_cast %4 : vector<256xf32> to vector<1x256xf32>
    %c0_3 = arith.constant 0 : index
    %c0_4 = arith.constant 0 : index
    %c0_5 = arith.constant 0 : index
    %6 = vector.load %arg1[%c0_3, %c0_4, %c0_5] : memref<2x256x256xf32, #tpu.memory_space<vmem>>, vector<1x256x256xf32>
    %7 = vector.shape_cast %6 : vector<1x256x256xf32> to vector<256x256xf32>
    %cst_6 = arith.constant dense<0.000000e+00> : vector<1x256xf32>
    %8 = tpu.matmul %3, %7, %cst_6 {dimension_numbers = #tpu.dot_dimension_numbers<[1], [0], [0], [1], [0, 0, 1, 1], [], []>} : vector<1x256xf32>, vector<256x256xf32>, vector<1x256xf32> -> vector<1x256xf32>
    %c1 = arith.constant 1 : index
    %c0_7 = arith.constant 0 : index
    %c0_8 = arith.constant 0 : index
    %9 = vector.load %arg1[%c1, %c0_7, %c0_8] : memref<2x256x256xf32, #tpu.memory_space<vmem>>, vector<1x256x256xf32>
    %10 = vector.shape_cast %9 : vector<1x256x256xf32> to vector<256x256xf32>
    %cst_9 = arith.constant dense<0.000000e+00> : vector<1x256xf32>
    %11 = tpu.matmul %5, %10, %cst_9 {dimension_numbers = #tpu.dot_dimension_numbers<[1], [0], [0], [1], [0, 0, 1, 1], [], []>} : vector<1x256xf32>, vector<256x256xf32>, vector<1x256xf32> -> vector<1x256xf32>
    %12 = arith.addf %8, %11 : vector<1x256xf32>
    %13 = arith.negf %12 : vector<1x256xf32>
    %14 = math.exp %13 : vector<1x256xf32>
    %cst_10 = arith.constant 1.000000e+00 : f32
    %15 = vector.broadcast %cst_10 : f32 to vector<1x256xf32>
    %16 = arith.addf %15, %14 : vector<1x256xf32>
    %17 = arith.divf %15, %16 : vector<1x256xf32>
    %18 = vector.broadcast %17 : vector<1x256xf32> to vector<4x256xf32>
    %19 = arith.mulf %1, %18 : vector<4x256xf32>
    %c0_11 = arith.constant 0 : index
    %c0_12 = arith.constant 0 : index
    %c0_13 = arith.constant 0 : index
    %20 = vector.load %arg3[%c0_11, %c0_12, %c0_13] : memref<1x4x256xf32, #tpu.memory_space<vmem>>, vector<1x4x256xf32>
    %21 = vector.shape_cast %20 : vector<1x4x256xf32> to vector<4x256xf32>
    %22 = vector.shape_cast %19 : vector<4x256xf32> to vector<1x4x256xf32>
    tpu.vector_store %arg3[%c0_11, %c0_12, %c0_13], %22 {strides = array<i32>} : memref<1x4x256xf32, #tpu.memory_space<vmem>>, vector<1x4x256xf32>,
    return
  }
  func.func @transform_0(%arg0: i32) -> (i32, i32, i32) {
    %c0_i32 = arith.constant 0 : i32
    %c0_i32_0 = arith.constant 0 : i32
    %c0_i32_1 = arith.constant 0 : i32
    %c0_i32_2 = arith.constant 0 : i32
    return %c0_i32, %c0_i32_0, %c0_i32_1 : i32, i32, i32
  }
  func.func @transform_1(%arg0: i32) -> (i32, i32, i32) {
    %c0_i32 = arith.constant 0 : i32
    %c0_i32_0 = arith.constant 0 : i32
    %c0_i32_1 = arith.constant 0 : i32
    return %arg0, %c0_i32, %c0_i32_0 : i32, i32, i32
  }
  func.func @transform_2(%arg0: i32) -> (i32, i32, i32) {
    %c0_i32 = arith.constant 0 : i32
    %c0_i32_0 = arith.constant 0 : i32
    %c0_i32_1 = arith.constant 0 : i32
    return %arg0, %c0_i32, %c0_i32_0 : i32, i32, i32
  }
}

</mosaic_0001>

<bundles_post_ra>
// kernel: tpu_custom_call.1
= control target key start
LH: loop header
LB: loop body
LE: loop exit
PB: predicated region body
PF: predicated region fallthrough
CT: control target
= control target key end

     0   :  { %7 = vsyncpa [#allocation3], 0  ;;  %s1006_s0 = inlined_call_operand.hbm [shape: f32[2,256,256], index: 0, kind: input, shape index: {}]   ;;  %s1007_s1 = inlined_call_operand.hbm [shape: f32[2,4,256], index: 1, kind: input, shape index: {}]   ;;  %s1008_s2 = inlined_call_operand.hbm [shape: f32[2,4,256], index: 2, kind: output, shape index: {}]  }
   0x1   :  { %8 = vsyncpa [#allocation6], 0 }
   0x2   :  { %10 = vsyncpa [#allocation6 + $0x1], 0 }
   0x3   :  { %11 = vsyncpa [#allocation4], 0 }
   0x4   :  { %13 = vsyncpa [#allocation4 + $0x1], 0  ;;  %s834_s9 = smov 0   ;;  %s836_s10 = smov 0  }
   0x5   :  { %s838_s11 = smov 0   ;;  %s840_s12 = smov 0  }
   0x6 LB: > { %s855_s13 = sadd.s32 4294967295, %s812_s12   ;;  %s602_s14 = sadd.s32 4294967294, %s812_s12   ;;  %s812_s12 = sphi %s840_s12, %s1030_s12   ;;  %s808_s11 = sphi %s838_s11, %s1029_s11   ;;  %s804_s10 = sphi %s836_s10, %s1028_s10   ;;  %s800_s9 = sphi %s834_s9, %s1027_s9  }
   0x7   : > { %p60_p0 = scmp.ne.s32.totalorder %s804_s10, %s800_s9  ;;  %p1009_p1 = scmp.eq.s32.totalorder %s855_s13, 0 }
   0x8   : > { %p90_p3 = scmp.eq.s32.totalorder %s602_s14, 1  ;;  %p603_p5 = scmp.ge.s32.totalorder %s812_s12, 1 }
   0x9   : > { %p864_p4 = por %p1009_p1, %p60_p0  ;;  %p97_p7 = scmp.lt.s32.totalorder %s812_s12, 3 }
   0xa   : > { %p869_p6 = por %p90_p3, %p60_p0  ;;  %s814_s18 = smov [#allocation2]  }
   0xb   : > { %s1013_s15 = scalar_select %p864_p4, 1, 0 }
   0xc   : > { %s1014_s16 = scalar_select %p869_p6, 1, 0 }
   0xd   : > { %p874_p8 = pnand %p603_p5, %p97_p7  ;;  %s109_s19 = sshll.u32 %s814_s18, 4  ;;  %s110_s19 = int_to_ptr.vmem [resolvable:$true] %s109_s19 }
   0xe   : > { %s888_s21 = sadd.s32 1, %s812_s12   ;;  %s47_s22 = sadd.s32 1, %s808_s11 }
   0xf   : > { %s1015_s17 = scalar_select %p874_p8, 1, 0 }
  0x10   : > { %p630_p9 = pneg %p874_p8  ;;  %s44_s23 = ssub.s32 %s812_s12, %s888_s21 }
  0x11   : > { %s701_s24 = scalar_lea.vmem %s110_s19, 16384  ;;  %p709_p5 = scmp.lt.s32.totalorder %s110_s19, %s110_s19 }
  0x12   : > { %p883_p11 = pnand %p630_p9, %p1009_p1  ;;  %p702_p13 = scmp.ne.s32.totalorder %s110_s19, %s701_s24 }
  0x13   : > { %p710_p7 = scmp.lt.s32.totalorder %s701_s24, %s701_s24 }
  0x14   : > { %p692_p12 = pneg %p883_p11 }
  0x15   : > { %p711_p10 = por %p710_p7, %p709_p5 }
  0x16   : > { %p704_p0 = pnand %p702_p13, %p692_p12 }
  0x18   : > { %p705_p3 = pneg %p704_p0 }
  0x1a   : > { %p712_p2 = pnand %p711_p10, %p705_p3 }
  0x1c   : > { %715 = shalt.err (!%p712_p2)
}
  0x1d   : > { %s815_s25 = smov 256   ;;  %s816_s26 = smov 16  }
  0x1e   : > { %633 = dma.hbm_to_vmem [thread:$0]  (!%p883_p11), %s1006_s0, 16384, %s110_s19, [#allocation3], %s815_s25, %s815_s25, %s816_s26  }
  0x1f   : > { %p45_p9 = scmp.eq.s32.totalorder %s44_s23, 0  ;;  %p54_p12 = scmp.ne.s32.totalorder %s808_s11, %s804_s10 }
  0x20   : > { %p55_p10 = scmp.eq.s32.totalorder %s812_s12, 0  ;;  %p643_p2 = scmp.lt.s32.totalorder %s812_s12, 2 }
  0x21   : > { %s905_s29 = scalar_select %p45_p9, %s808_s11, %s47_s22  }
  0x22   : > { %p56_p13 = por %p55_p10, %p54_p12  ;;  %p1017_p0 = scmp.eq.s32.totalorder %s855_s13, 1 }
  0x23   : > { %s123_s3 = sand.u32 1, %s808_s11   ;;  %s620_s4 = sshll.u32 %s812_s12, 7 }
  0x24   : > { %p909_p3 = por %p1017_p0, %p54_p12  ;;  %s606_s5 = sshll.u32 %s123_s3, 3 }
  0x25   : > { %s918_s8 = scalar_lea.hbm %s1007_s1, %s620_s4  ;;  %s127_s14 = scalar_lea.vmem [#allocation5], %s606_s5 }
  0x26   : > { %s1018_s30 = scalar_select %p909_p3, 1, 0 }
  0x27   : > { %s135_s18 = sshll.u32 %s127_s14, 4  ;;  %p920_p11 = pnand %p643_p2, %p56_p13  ;;  %s136_s18 = int_to_ptr.vmem [resolvable:$true] %s135_s18 }
  0x28   : > { %s124_s20 = scalar_lea.sflag [#allocation6], %s123_s3  ;;  %s716_s22 = scalar_lea.hbm %s918_s8, 128 }
  0x29   : > { %p717_p5 = scmp.ne.s32.totalorder %s918_s8, %s716_s22  ;;  %p718_p7 = pneg %p920_p11 }
  0x2a   : > { %s721_s25 = scalar_lea.hbm %s1007_s1, 256  ;;  %p722_p10 = scmp.lt.s32.totalorder %s918_s8, %s1007_s1 }
  0x2b   : > { %p719_p9 = pnand %p718_p7, %p717_p5  ;;  %p723_p2 = scmp.lt.s32.totalorder %s721_s25, %s716_s22 }
  0x2d   : > { %p720_p12 = pneg %p719_p9  ;;  %p724_p13 = por %p723_p2, %p722_p10 }
  0x2f   : > { %p725_p0 = pnand %p724_p13, %p720_p12 }
  0x31   : > { %728 = shalt.err (!%p725_p0)
}
  0x32   : > { %s729_s28 = scalar_lea.vmem %s136_s18, 128  ;;  %s817_s3 = smov [#allocation5]  }
  0x33   : > { %p730_p1 = scmp.ne.s32.totalorder %s136_s18, %s729_s28  ;;  %s734_s4 = sshll.u32 %s817_s3, 4  ;;  %s735_s4 = int_to_ptr.vmem [resolvable:$false] %s734_s4 }
  0x34   : > { %s736_s5 = scalar_lea.vmem %s735_s4, 256  ;;  %p737_p5 = scmp.lt.s32.totalorder %s136_s18, %s735_s4 }
  0x35   : > { %p732_p6 = pnand %p730_p1, %p718_p7  ;;  %p738_p9 = scmp.lt.s32.totalorder %s736_s5, %s729_s28 }
  0x37   : > { %p733_p3 = pneg %p732_p6  ;;  %p739_p4 = por %p738_p9, %p737_p5 }
  0x39   : > { %p740_p8 = pnand %p739_p4, %p733_p3 }
  0x3b   : > { %743 = shalt.err (!%p740_p8)
}
  0x3c   : > { %637 = dma.hbm_to_vmem [thread:$0]  (!%p920_p11), %s918_s8, 128, %s136_s18, %s124_s20  }
  0x3d   : > { %p1020_p12 = scmp.ne.s32.totalorder %s1015_s17, 0 }
  0x3e   : > { %p1021_p10 = scmp.eq.s32.totalorder (!%p1020_p12), %s855_s13, 0 }
  0x3f   : > { %144 = sbr.rel (%p1020_p12) target bundleno = 388 (0x184), region = 28 }
  0x44   : > { %787 = dma.done.wait (%p1021_p10), [#allocation3], 16384   ;;  %p1022_p1 = pmov %p1021_p10 }
  0x45   : > { %s945_s6 = sand.u32 1, %s804_s10   ;;  %p1023_p4 = scmp.ne.s32.totalorder %s1013_s15, 0 }
  0x46   : > { %789 = vsyncadd (%p1022_p1), [#allocation3], 4294950912  ;;  %s611_s7 = sshll.u32 %s945_s6, 3  ;;  %s151_s14 = scalar_lea.sflag [#allocation6], %s945_s6 }
  0x47   : > { %s951_s8 = scalar_lea.vmem [#allocation5], %s611_s7 }
  0x48   : > { %791 = dma.done.wait (%p1023_p4), %s151_s14, 128  }
  0x49   : > { %793 = vsyncadd (%p1023_p4), %s151_s14, 4294967168  ;;  %v304_v0 = vld [vmem:[#allocation2 + $0x2f8] sm:$0xff]  ;;  %v303_v2 = vld [vmem:[#allocation2 + $0x2f0] sm:$0xff]  ;;  %vm179_vm0 = vcmask 1043456   ;;  %s621_s15 = sshll.u32 %s855_s13, 7  ;;  %s174_s17 = scalar_lea.vmem [#allocation7], %s611_s7 }
  0x4a   : > { %v239_v1 = vld [vmem:[#allocation2 + $0xf8] sm:$0xff]  ;;  %337 = vmatprep.subr.mxu0 %v304_v0  ;;  %v238_v3 = vld [vmem:[#allocation2 + $0xf0] sm:$0xff]  ;;  %v302_v4 = vld [vmem:[#allocation2 + $0x2e8] sm:$0xff]  ;;  %s520_s18 = sshll.u32 %s174_s17, 4  ;;  %s518_s22 = scalar_lea.hbm %s1008_s2, %s621_s15  ;;  %s521_s18 = int_to_ptr.vmem [resolvable:$true] %s520_s18 }
  0x4b   : > { %408 = vmatprep.subr.mxu1 %v239_v1  ;;  %v237_v5 = vld [vmem:[#allocation2 + $0xe8] sm:$0xff]  ;;  %338 = vmatpush1.msra.mxu0 %v303_v2  ;;  %v301_v6 = vld [vmem:[#allocation2 + $0x2e0] sm:$0xff]  ;;  %v300_v8 = vld [vmem:[#allocation2 + $0x2d8] sm:$0xff]  ;;  %s506_s23 = scalar_lea.sflag [#allocation4], %s945_s6  ;;  %s744_s24 = scalar_lea.vmem %s521_s18, 128 }
  0x4c   : > { %409 = vmatpush1.msra.mxu1 %v238_v3  ;;  %v236_v7 = vld [vmem:[#allocation2 + $0xe0] sm:$0xff]  ;;  %339 = vmatprep.subr.mxu0 %v302_v4  ;;  %v235_v9 = vld [vmem:[#allocation2 + $0xd8] sm:$0xff]  ;;  %v299_v10 = vld [vmem:[#allocation2 + $0x2d0] sm:$0xff]  ;;  %p745_p6 = scmp.ne.s32.totalorder %s521_s18, %s744_s24  ;;  %p1024_p8 = scmp.ne.s32.totalorder %s1018_s30, 0 }
  0x4d   : > { %410 = vmatprep.subr.mxu1 %v237_v5  ;;  %v234_v11 = vld [vmem:[#allocation2 + $0xd0] sm:$0xff]  ;;  %340 = vmatpush1.msra.mxu0 %v301_v6  ;;  %v298_v12 = vld [vmem:[#allocation2 + $0x2c8] sm:$0xff]  ;;  %v297_v14 = vld [vmem:[#allocation2 + $0x2c0] sm:$0xff]  ;;  %s818_s25 = smov [#allocation7]  }
  0x4e   : > { %411 = vmatpush1.msra.mxu1 %v236_v7  ;;  %v233_v13 = vld [vmem:[#allocation2 + $0xc8] sm:$0xff]  ;;  %341 = vmatprep.subr.mxu0 %v300_v8  ;;  %v232_v15 = vld [vmem:[#allocation2 + $0xc0] sm:$0xff]  ;;  %v296_v16 = vld [vmem:[#allocation2 + $0x2b8] sm:$0xff]  ;;  %p746_p3 = pnand %p745_p6, %p1024_p8  ;;  %s748_s13 = sshll.u32 %s818_s25, 4  ;;  %s749_s13 = int_to_ptr.vmem [resolvable:$false] %s748_s13 }
  0x4f   : > { %412 = vmatprep.subr.mxu1 %v235_v9  ;;  %342 = vmatpush1.msra.mxu0 %v299_v10  ;;  %v231_v17 = vld [vmem:[#allocation2 + $0xb8] sm:$0xff]  ;;  %v295_v18 = vld [vmem:[#allocation2 + $0x2b0] sm:$0xff]  ;;  %v294_v20 = vld [vmem:[#allocation2 + $0x2a8] sm:$0xff]  ;;  %s750_s26 = scalar_lea.vmem %s749_s13, 256  ;;  %p751_p7 = scmp.lt.s32.totalorder %s521_s18, %s749_s13 }
  0x50   : > { %413 = vmatpush1.msra.mxu1 %v234_v11  ;;  %343 = vmatprep.subr.mxu0 %v298_v12  ;;  %v230_v19 = vld [vmem:[#allocation2 + $0xb0] sm:$0xff]  ;;  %v229_v21 = vld [vmem:[#allocation2 + $0xa8] sm:$0xff]  ;;  %v293_v22 = vld [vmem:[#allocation2 + $0x2a0] sm:$0xff]  ;;  %p747_p11 = pneg %p746_p3  ;;  %p752_p2 = scmp.lt.s32.totalorder %s750_s26, %s744_s24 }
  0x51   : > { %414 = vmatprep.subr.mxu1 %v233_v13  ;;  %344 = vmatpush1.msra.mxu0 %v297_v14  ;;  %v228_v23 = vld [vmem:[#allocation2 + $0xa0] sm:$0xff]  ;;  %v292_v24 = vld [vmem:[#allocation2 + $0x298] sm:$0xff]  ;;  %v291_v26 = vld [vmem:[#allocation2 + $0x290] sm:$0xff] }
  0x52   : > { %415 = vmatpush1.msra.mxu1 %v232_v15  ;;  %345 = vmatprep.subr.mxu0 %v296_v16  ;;  %v227_v25 = vld [vmem:[#allocation2 + $0x98] sm:$0xff]  ;;  %v226_v27 = vld [vmem:[#allocation2 + $0x90] sm:$0xff]  ;;  %v290_v28 = vld [vmem:[#allocation2 + $0x288] sm:$0xff]  ;;  %p753_p13 = por %p752_p2, %p751_p7 }
  0x53   : > { %416 = vmatprep.subr.mxu1 %v231_v17  ;;  %346 = vmatpush1.msra.mxu0 %v295_v18  ;;  %v225_v29 = vld [vmem:[#allocation2 + $0x88] sm:$0xff]  ;;  %v289_v30 = vld [vmem:[#allocation2 + $0x280] sm:$0xff]  ;;  %v288_v32 = vld [vmem:[#allocation2 + $0x278] sm:$0xff] }
  0x54   : > { %417 = vmatpush1.msra.mxu1 %v230_v19  ;;  %347 = vmatprep.subr.mxu0 %v294_v20  ;;  %v224_v31 = vld [vmem:[#allocation2 + $0x80] sm:$0xff]  ;;  %v223_v33 = vld [vmem:[#allocation2 + $0x78] sm:$0xff]  ;;  %v287_v34 = vld [vmem:[#allocation2 + $0x270] sm:$0xff]  ;;  %p754_p0 = pnand %p753_p13, %p747_p11 }
  0x55   : > { %418 = vmatprep.subr.mxu1 %v229_v21  ;;  %348 = vmatpush1.msra.mxu0 %v293_v22  ;;  %v222_v35 = vld [vmem:[#allocation2 + $0x70] sm:$0xff]  ;;  %v286_v36 = vld [vmem:[#allocation2 + $0x268] sm:$0xff]  ;;  %v285_v38 = vld [vmem:[#allocation2 + $0x260] sm:$0xff] }
  0x56   : > { %419 = vmatpush1.msra.mxu1 %v228_v23  ;;  %349 = vmatprep.subr.mxu0 %v292_v24  ;;  %v221_v37 = vld [vmem:[#allocation2 + $0x68] sm:$0xff]  ;;  %v220_v39 = vld [vmem:[#allocation2 + $0x60] sm:$0xff]  ;;  %v284_v40 = vld [vmem:[#allocation2 + $0x258] sm:$0xff] }
  0x57   : > { %420 = vmatprep.subr.mxu1 %v227_v25  ;;  %350 = vmatpush1.msra.mxu0 %v291_v26  ;;  %v219_v41 = vld [vmem:[#allocation2 + $0x58] sm:$0xff]  ;;  %v283_v42 = vld [vmem:[#allocation2 + $0x250] sm:$0xff]  ;;  %v282_v44 = vld [vmem:[#allocation2 + $0x248] sm:$0xff] }
  0x58   : > { %421 = vmatpush1.msra.mxu1 %v226_v27  ;;  %351 = vmatprep.subr.mxu0 %v290_v28  ;;  %v218_v43 = vld [vmem:[#allocation2 + $0x50] sm:$0xff]  ;;  %v217_v45 = vld [vmem:[#allocation2 + $0x48] sm:$0xff]  ;;  %v281_v46 = vld [vmem:[#allocation2 + $0x240] sm:$0xff] }
  0x59   : > { %422 = vmatprep.subr.mxu1 %v225_v29  ;;  %352 = vmatpush1.msra.mxu0 %v289_v30  ;;  %v216_v47 = vld [vmem:[#allocation2 + $0x40] sm:$0xff]  ;;  %v280_v48 = vld [vmem:[#allocation2 + $0x238] sm:$0xff]  ;;  %v279_v50 = vld [vmem:[#allocation2 + $0x230] sm:$0xff] }
  0x5a   : > { %423 = vmatpush1.msra.mxu1 %v224_v31  ;;  %353 = vmatprep.subr.mxu0 %v288_v32  ;;  %v215_v49 = vld [vmem:[#allocation2 + $0x38] sm:$0xff]  ;;  %v214_v51 = vld [vmem:[#allocation2 + $0x30] sm:$0xff]  ;;  %v278_v52 = vld [vmem:[#allocation2 + $0x228] sm:$0xff] }
  0x5b   : > { %424 = vmatprep.subr.mxu1 %v223_v33  ;;  %354 = vmatpush1.msra.mxu0 %v287_v34  ;;  %v213_v53 = vld [vmem:[#allocation2 + $0x28] sm:$0xff]  ;;  %v277_v54 = vld [vmem:[#allocation2 + $0x220] sm:$0xff]  ;;  %v276_v56 = vld [vmem:[#allocation2 + $0x218] sm:$0xff] }
  0x5c   : > { %425 = vmatpush1.msra.mxu1 %v222_v35  ;;  %355 = vmatprep.subr.mxu0 %v286_v36  ;;  %v212_v55 = vld [vmem:[#allocation2 + $0x20] sm:$0xff]  ;;  %v211_v57 = vld [vmem:[#allocation2 + $0x18] sm:$0xff]  ;;  %v275_v58 = vld [vmem:[#allocation2 + $0x210] sm:$0xff] }
  0x5d   : > { %426 = vmatprep.subr.mxu1 %v221_v37  ;;  %356 = vmatpush1.msra.mxu0 %v285_v38  ;;  %v210_v59 = vld [vmem:[#allocation2 + $0x10] sm:$0xff]  ;;  %v274_v60 = vld [vmem:[#allocation2 + $0x208] sm:$0xff]  ;;  %v273_v62 = vld [vmem:[#allocation2 + $0x200] sm:$0xff] }
  0x5e   : > { %427 = vmatpush1.msra.mxu1 %v220_v39  ;;  %357 = vmatprep.subr.mxu0 %v284_v40  ;;  %v209_v61 = vld [vmem:[#allocation2 + $0x8] sm:$0xff]  ;;  %v208_v63 = vld [vmem:[#allocation2] sm:$0xff]  ;;  %v336_v0 = vld [vmem:[#allocation2 + $0x3f8] sm:$0xff] }
  0x5f   : > { %428 = vmatprep.subr.mxu1 %v219_v41  ;;  %358 = vmatpush1.msra.mxu0 %v283_v42  ;;  %v271_v1 = vld [vmem:[#allocation2 + $0x1f8] sm:$0xff]  ;;  %v335_v2 = vld [vmem:[#allocation2 + $0x3f0] sm:$0xff]  ;;  %v334_v4 = vld [vmem:[#allocation2 + $0x3e8] sm:$0xff] }
  0x60   : > { %429 = vmatpush1.msra.mxu1 %v218_v43  ;;  %359 = vmatprep.subr.mxu0 %v282_v44  ;;  %v270_v3 = vld [vmem:[#allocation2 + $0x1f0] sm:$0xff]  ;;  %v269_v5 = vld [vmem:[#allocation2 + $0x1e8] sm:$0xff]  ;;  %v333_v6 = vld [vmem:[#allocation2 + $0x3e0] sm:$0xff] }
  0x61   : > { %430 = vmatprep.subr.mxu1 %v217_v45  ;;  %360 = vmatpush1.msra.mxu0 %v281_v46  ;;  %v268_v7 = vld [vmem:[#allocation2 + $0x1e0] sm:$0xff]  ;;  %v332_v8 = vld [vmem:[#allocation2 + $0x3d8] sm:$0xff]  ;;  %v331_v10 = vld [vmem:[#allocation2 + $0x3d0] sm:$0xff] }
  0x62   : > { %431 = vmatpush1.msra.mxu1 %v216_v47  ;;  %361 = vmatprep.subr.mxu0 %v280_v48  ;;  %v267_v9 = vld [vmem:[#allocation2 + $0x1d8] sm:$0xff]  ;;  %v266_v11 = vld [vmem:[#allocation2 + $0x1d0] sm:$0xff]  ;;  %v330_v12 = vld [vmem:[#allocation2 + $0x3c8] sm:$0xff] }
  0x63   : > { %432 = vmatprep.subr.mxu1 %v215_v49  ;;  %362 = vmatpush1.msra.mxu0 %v279_v50  ;;  %v265_v13 = vld [vmem:[#allocation2 + $0x1c8] sm:$0xff]  ;;  %v329_v14 = vld [vmem:[#allocation2 + $0x3c0] sm:$0xff]  ;;  %v328_v16 = vld [vmem:[#allocation2 + $0x3b8] sm:$0xff] }
  0x64   : > { %433 = vmatpush1.msra.mxu1 %v214_v51  ;;  %363 = vmatprep.subr.mxu0 %v278_v52  ;;  %v264_v15 = vld [vmem:[#allocation2 + $0x1c0] sm:$0xff]  ;;  %v263_v17 = vld [vmem:[#allocation2 + $0x1b8] sm:$0xff]  ;;  %v327_v18 = vld [vmem:[#allocation2 + $0x3b0] sm:$0xff] }
  0x65   : > { %434 = vmatprep.subr.mxu1 %v213_v53  ;;  %364 = vmatpush1.msra.mxu0 %v277_v54  ;;  %v262_v19 = vld [vmem:[#allocation2 + $0x1b0] sm:$0xff]  ;;  %v326_v20 = vld [vmem:[#allocation2 + $0x3a8] sm:$0xff]  ;;  %v325_v22 = vld [vmem:[#allocation2 + $0x3a0] sm:$0xff] }
  0x66   : > { %435 = vmatpush1.msra.mxu1 %v212_v55  ;;  %365 = vmatprep.subr.mxu0 %v276_v56  ;;  %v261_v21 = vld [vmem:[#allocation2 + $0x1a8] sm:$0xff]  ;;  %v260_v23 = vld [vmem:[#allocation2 + $0x1a0] sm:$0xff]  ;;  %v324_v24 = vld [vmem:[#allocation2 + $0x398] sm:$0xff] }
  0x67   : > { %436 = vmatprep.subr.mxu1 %v211_v57  ;;  %366 = vmatpush1.msra.mxu0 %v275_v58  ;;  %v259_v25 = vld [vmem:[#allocation2 + $0x198] sm:$0xff]  ;;  %v958_v26 = vld [vmem:[%s951_s8] sm:$0xff]  ;;  %v323_v27 = vld [vmem:[#allocation2 + $0x390] sm:$0xff] }
  0x68   : > { %437 = vmatpush1.msra.mxu1 %v210_v59  ;;  %367 = vmatprep.subr.mxu0 %v274_v60  ;;  %v258_v28 = vld [vmem:[#allocation2 + $0x190] sm:$0xff]  ;;  %v177_v29 = vcombine.high %v958_v26, %v958_v26  ;;  %v194_v30 = vsel %vm179_vm0, %v958_v26, -inf  ;;  %v180_v31 = vsel %vm179_vm0, %v958_v26, 0.0  ;;  %v322_v32 = vld [vmem:[#allocation2 + $0x388] sm:$0xff]  ;;  %v321_v36 = vld [vmem:[#allocation2 + $0x380] sm:$0xff] }
  0x69   : > { %438 = vmatprep.subr.mxu1 %v209_v61  ;;  %368 = vmatpush1.msra.mxu0 %v273_v62  ;;  %v257_v33 = vld [vmem:[#allocation2 + $0x188] sm:$0xff]  ;;  %v195_v34 = vrot.slane %v194_v30, 4  ;;  %v181_v35 = vrot.slane %v180_v31, 4  ;;  %v256_v37 = vld [vmem:[#allocation2 + $0x180] sm:$0xff]  ;;  %v320_v40 = vld [vmem:[#allocation2 + $0x378] sm:$0xff] }
  0x6a   : > { %439 = vmatpush1.msra.mxu1 %v208_v63  ;;  %369 = vmatprep.subr.mxu0 %v336_v0  ;;  %v201_v38 = vsel %vm179_vm0, %v177_v29, -inf  ;;  %v187_v39 = vsel %vm179_vm0, %v177_v29, 0.0  ;;  %v255_v41 = vld [vmem:[#allocation2 + $0x178] sm:$0xff]  ;;  %v319_v46 = vld [vmem:[#allocation2 + $0x370] sm:$0xff]  ;;  %v318_v48 = vld [vmem:[#allocation2 + $0x368] sm:$0xff] }
  0x6b   : > { %440 = vmatprep.subr.mxu1 %v271_v1  ;;  %370 = vmatpush2.msra.mxu0 %v335_v2  ;;  %v202_v42 = vrot.slane %v201_v38, 4  ;;  %v188_v43 = vrot.slane %v187_v39, 4  ;;  %v196_v44 = vmax.f32 %v194_v30, %v195_v34  ;;  %v182_v45 = vadd.f32 %v181_v35, %v180_v31  ;;  %v254_v47 = vld [vmem:[#allocation2 + $0x170] sm:$0xff]  ;;  %v253_v49 = vld [vmem:[#allocation2 + $0x168] sm:$0xff]  ;;  %v317_v52 = vld [vmem:[#allocation2 + $0x360] sm:$0xff] }
  0x6c   : > { %441 = vmatpush2.msra.mxu1 %v270_v3  ;;  %371 = vmatprep.subr.mxu0 %v334_v4  ;;  %v252_v53 = vld [vmem:[#allocation2 + $0x160] sm:$0xff]  ;;  %v316_v54 = vld [vmem:[#allocation2 + $0x358] sm:$0xff]  ;;  %v315_v60 = vld [vmem:[#allocation2 + $0x350] sm:$0xff] }
  0x6d   : > { %442 = vmatprep.subr.mxu1 %v269_v5  ;;  %372 = vmatpush2.msra.mxu0 %v333_v6  ;;  %v203_v50 = vmax.f32 %v201_v38, %v202_v42  ;;  %v189_v51 = vadd.f32 %v188_v43, %v187_v39  ;;  %v251_v55 = vld [vmem:[#allocation2 + $0x158] sm:$0xff]  ;;  %v197_v58 = vrot.slane %v196_v44, 2  ;;  %v183_v59 = vrot.slane %v182_v45, 2  ;;  %v250_v61 = vld [vmem:[#allocation2 + $0x150] sm:$0xff]  ;;  %v314_v62 = vld [vmem:[#allocation2 + $0x348] sm:$0xff] }
  0x6e   : > { %443 = vmatpush2.msra.mxu1 %v268_v7  ;;  %373 = vmatprep.subr.mxu0 %v332_v8  ;;  %v249_v63 = vld [vmem:[#allocation2 + $0x148] sm:$0xff]  ;;  %v313_v1 = vld [vmem:[#allocation2 + $0x340] sm:$0xff]  ;;  %v312_v4 = vld [vmem:[#allocation2 + $0x338] sm:$0xff]  ;;  %v491_v43 = vlaneseq }
  0x6f   : > { %444 = vmatprep.subr.mxu1 %v267_v9  ;;  %374 = vmatpush2.msra.mxu0 %v331_v10  ;;  %v204_v56 = vrot.slane %v203_v50, 2  ;;  %v190_v57 = vrot.slane %v189_v51, 2  ;;  %v248_v2 = vld [vmem:[#allocation2 + $0x140] sm:$0xff]  ;;  %v247_v5 = vld [vmem:[#allocation2 + $0x138] sm:$0xff]  ;;  %v198_v6 = vmax.f32 %v196_v44, %v197_v58  ;;  %v184_v7 = vadd.f32 %v183_v59, %v182_v45  ;;  %v311_v8 = vld [vmem:[#allocation2 + $0x330] sm:$0xff] }
  0x70   : > { %445 = vmatpush2.msra.mxu1 %v266_v11  ;;  %375 = vmatprep.subr.mxu0 %v330_v12  ;;  %v246_v9 = vld [vmem:[#allocation2 + $0x130] sm:$0xff]  ;;  %v310_v10 = vld [vmem:[#allocation2 + $0x328] sm:$0xff]  ;;  %v492_v44 = vshrl.u32 %v491_v43, 7 }
  0x71   : > { %446 = vmatprep.subr.mxu1 %v265_v13  ;;  %376 = vmatpush2.msra.mxu0 %v329_v14  ;;  %v205_v0 = vmax.f32 %v203_v50, %v204_v56  ;;  %v191_v3 = vadd.f32 %v190_v57, %v189_v51  ;;  %v245_v11 = vld [vmem:[#allocation2 + $0x128] sm:$0xff]  ;;  %v309_v13 = vld [vmem:[#allocation2 + $0x320] sm:$0xff] }
  0x72   : > { %447 = vmatpush2.msra.mxu1 %v264_v15  ;;  %377 = vmatprep.subr.mxu0 %v328_v16  ;;  %v244_v14 = vld [vmem:[#allocation2 + $0x120] sm:$0xff]  ;;  %v308_v16 = vld [vmem:[#allocation2 + $0x318] sm:$0xff]  ;;  %v493_v45 = vsub.s32 0, %v492_v44 }
  0x73   : > { %448 = vmatprep.subr.mxu1 %v263_v17  ;;  %378 = vmatpush2.msra.mxu0 %v327_v18  ;;  %v206_v12 = vrot.slane %v205_v0, 1  ;;  %v192_v15 = vrot.slane %v191_v3, 1  ;;  %v243_v17 = vld [vmem:[#allocation2 + $0x118] sm:$0xff]  ;;  %v199_v18 = vrot.slane %v198_v6, 1 }
  0x74   : > { %449 = vmatpush2.msra.mxu1 %v262_v19  ;;  %379 = vmatprep.subr.mxu0 %v326_v20  ;;  %v185_v19 = vrot.slane %v184_v7, 1  ;;  %v307_v20 = vld [vmem:[#allocation2 + $0x310] sm:$0xff] }
  0x75   : > { %450 = vmatprep.subr.mxu1 %v261_v21  ;;  %380 = vmatpush2.msra.mxu0 %v325_v22  ;;  %v242_v21 = vld [vmem:[#allocation2 + $0x110] sm:$0xff]  ;;  %v306_v22 = vld [vmem:[#allocation2 + $0x308] sm:$0xff]  ;;  %v200_v29 = vmax.f32 %v198_v6, %v199_v18 }
  0x76   : > { %451 = vmatpush2.msra.mxu1 %v260_v23  ;;  %381 = vmatprep.subr.mxu0 %v324_v24  ;;  %v241_v23 = vld [vmem:[#allocation2 + $0x108] sm:$0xff]  ;;  %v207_v24 = vmax.f32 %v205_v0, %v206_v12  ;;  %v186_v30 = vadd.f32 %v185_v19, %v184_v7 }
  0x77   : > { %452 = vmatprep.subr.mxu1 %v259_v25  ;;  %382 = vmatpush2.msra.mxu0 %v323_v27  ;;  %v305_v25 = vld [vmem:[#allocation2 + $0x300] sm:$0xff]  ;;  %v193_v27 = vadd.f32 %v192_v15, %v191_v3 }
  0x78   : > { %453 = vmatpush2.msra.mxu1 %v258_v28  ;;  %383 = vmatprep.subr.mxu0 %v322_v32  ;;  %v240_v28 = vld [vmem:[#allocation2 + $0x100] sm:$0xff] }
  0x79   : > { %454 = vmatprep.subr.mxu1 %v257_v33  ;;  %384 = vmatpush2.msra.mxu0 %v321_v36 }
  0x7a   : > { %455 = vmatpush2.msra.mxu1 %v256_v37  ;;  %385 = vmatprep.subr.mxu0 %v320_v40 }
  0x7b   : > { %456 = vmatprep.subr.mxu1 %v255_v41  ;;  %386 = vmatpush2.msra.mxu0 %v319_v46 }
  0x7c   : > { %457 = vmatpush2.msra.mxu1 %v254_v47  ;;  %387 = vmatprep.subr.mxu0 %v318_v48 }
  0x7d   : > { %458 = vmatprep.subr.mxu1 %v253_v49  ;;  %388 = vmatpush2.msra.mxu0 %v317_v52 }
  0x7e   : > { %459 = vmatpush2.msra.mxu1 %v252_v53  ;;  %389 = vmatprep.subr.mxu0 %v316_v54 }
  0x7f   : > { %460 = vmatprep.subr.mxu1 %v251_v55  ;;  %390 = vmatpush2.msra.mxu0 %v315_v60 }
  0x80   : > { %461 = vmatpush2.msra.mxu1 %v250_v61  ;;  %391 = vmatprep.subr.mxu0 %v314_v62 }
  0x81   : > { %462 = vmatprep.subr.mxu1 %v249_v63  ;;  %392 = vmatpush2.msra.mxu0 %v313_v1 }
  0x82   : > { %463 = vmatpush2.msra.mxu1 %v248_v2  ;;  %393 = vmatprep.subr.mxu0 %v312_v4 }
  0x83   : > { %464 = vmatprep.subr.mxu1 %v247_v5  ;;  %394 = vmatpush2.msra.mxu0 %v311_v8 }
  0x84   : > { %465 = vmatpush2.msra.mxu1 %v246_v9  ;;  %395 = vmatprep.subr.mxu0 %v310_v10 }
  0x85   : > { %466 = vmatprep.subr.mxu1 %v245_v11  ;;  %396 = vmatpush2.msra.mxu0 %v309_v13 }
  0x86   : > { %467 = vmatpush2.msra.mxu1 %v244_v14  ;;  %397 = vmatprep.subr.mxu0 %v308_v16 }
  0x87   : > { %468 = vmatprep.subr.mxu1 %v243_v17  ;;  %398 = vmatpush2.msra.mxu0 %v307_v20 }
  0x88   : > { %469 = vmatpush2.msra.mxu1 %v242_v21  ;;  %399 = vmatprep.subr.mxu0 %v306_v22 }
  0x89   : > { %470 = vmatprep.subr.mxu1 %v241_v23  ;;  %400 = vmatpush2.msra.mxu0 %v305_v25 }
  0x8a   : > { %401 = vmatprep.mubr.f32.mxu0 %v207_v24  ;;  %471 = vmatpush2.msra.mxu1 %v240_v28 }
  0x8b   : > { %472 = vmatprep.mubr.f32.mxu1 %v193_v27  ;;  %402 = vmatmul.mubr.f32.vlgmr.msra.gmra.mxu0 %v200_v29 }
  0x8c   : > { %473 = vmatmul.mubr.f32.vlgmr.msra.gmra.mxu1 %v186_v30 }
 0x14b   : > { %v403_v31 = vpop.f32.mrf.mxu0 }
 0x14c   : > { %v474_v32 = vpop.f32.mrf.mxu1 }
 0x14d   : > { %v475_v33 = vadd.f32 %v474_v32, %v403_v31  ;;  %v405_v34 = vpop.f32.mrf.mxu0 }
 0x14e   : > { %v476_v35 = vpop.f32.mrf.mxu1 }
 0x14f   : > { %v613_v36 = vmul.f32 -1.442695, %v475_v33  ;;  %v477_v37 = vadd.f32 %v476_v35, %v405_v34 }
 0x151   : > { %682 = vpow2.f32 %v613_v36  ;;  %v614_v38 = vmul.f32 -1.442695, %v477_v37 }
 0x153   : > { %684 = vpow2.f32 %v614_v38 }
 0x15e   : > { %v683_v39 = vpop.eup %682 }
 0x15f   : > { %v485_v40 = vadd.f32 1.0, %v683_v39 }
 0x160   : > { %v685_v41 = vpop.eup %684 }
 0x161   : > { %686 = vrcp.f32 %v485_v40  ;;  %v486_v42 = vadd.f32 1.0, %v685_v41 }
 0x163   : > { %688 = vrcp.f32 %v486_v42 }
 0x16e   : > { %v687_v46 = vpop.eup %686 }
 0x16f   : > { %v494_v48 = vrot.slane %v687_v46, %v493_v45 }
 0x170   : > { %v689_v47 = vpop.eup %688 }
 0x171   : > { %v498_v49 = vrot.slane %v689_v47, %v493_v45 }
 0x173   : > { %v501_v50 = vcombine.low %v494_v48, %v498_v49 }
 0x175   : > { %v503_v51 = vmul.f32 %v501_v50, %v958_v26 }
 0x177   : > { %504 = vst [vmem:[%s174_s17] sm:$0xff] %v503_v51 }
 0x178   : > { %757 = shalt.err (!%p754_p0)
}
 0x179   : > { %s758_s27 = scalar_lea.hbm %s518_s22, 128  ;;  %s762_s4 = scalar_lea.hbm %s1008_s2, 256 }
 0x17a   : > { %p759_p5 = scmp.ne.s32.totalorder %s518_s22, %s758_s27  ;;  %p763_p10 = scmp.lt.s32.totalorder %s518_s22, %s1008_s2 }
 0x17b   : > { %p764_p1 = scmp.lt.s32.totalorder %s762_s4, %s758_s27 }
 0x17c   : > { %p760_p9 = pnand %p759_p5, %p1024_p8 }
 0x17d   : > { %p765_p4 = por %p764_p1, %p763_p10 }
 0x17e   : > { %p761_p12 = pneg %p760_p9 }
 0x180   : > { %p766_p6 = pnand %p765_p4, %p761_p12 }
 0x182   : > { %769 = shalt.err (!%p766_p6)
}
 0x183   : > { %628 = dma.vmem_to_hbm [thread:$0]  (%p1024_p8), %s521_s18, 128, %s518_s22, %s506_s23  }
 0x184 PF: > { %s532_s7 = sand.u32 1, %s800_s9   ;;  %p1025_p3 = scmp.ne.s32.totalorder %s1014_s16, 0 }
 0x185   : > { %p1026_p11 = scmp.ge.s32.totalorder %s812_s12, 2  ;;  %s533_s14 = scalar_lea.sflag [#allocation4], %s532_s7 }
 0x187   : > { %p639_p7 = pnand %p1026_p11, %p1025_p3 }
 0x189   : > { %p640_p2 = pneg %p639_p7 }
 0x18b   : > { %795 = dma.done.wait (%p640_p2), %s533_s14, 128  }
 0x18c   : > { %797 = vsyncadd (%p640_p2), %s533_s14, 4294967168  ;;  %p16_p13 = scmp.ge.s32.totalorder %s888_s21, 4   ;;  %s1027_s9 = smov %s804_s10 }
 0x18d   : > { %s1028_s10 = smov %s808_s11  ;;  %s1029_s11 = smov %s905_s29 }
 0x18e   : > { %s1030_s12 = smov %s888_s21  ;;  %18 = sbr.rel (!%p16_p13) target bundleno = 6 (0x6), region = 79 }
 0x193   :  { %538 = vsyncpa [#allocation3], 1 }
 0x194   :  { %540 = vsyncpa [#allocation3 + $0x1], 1 }
 0x195   :  { %541 = vsyncpa [#allocation6], 1 }
 0x196   :  { %543 = vsyncpa [#allocation6 + $0x1], 1 }
 0x197   :  { %544 = vsyncpa [#allocation4], 1 }
 0x198   :  { %546 = vsyncpa [#allocation4 + $0x1], 1 }

</bundles_post_ra>
